<compile_context>
chip_gen: v7x
topology: tpu7x:2x2x1
jax: 0.10.0
libtpu: 0.0.40
codegen_flags: <defaults>
</compile_context>

<pallas_src>
import functools

import jax
import jax.numpy as jnp
from jax.experimental import pallas as pl
from jax.experimental.pallas import tpu as pltpu

_LANE = 128
_SUBLANE = 8
_MAX_TM = 512      # batch tile cap (v5e/v6e sweet spot; fits v7x budget too)
_MAX_TN = 512      # output-feature tile cap
_MAX_TK = 2048     # reduction tile cap


def _round_up(v, m):
    return ((v + m - 1) // m) * m


def _cdiv(a, b):
    return (a + b - 1) // b


def _balanced_pad(dim, unit, max_tile):
    """Pad `dim` so it splits into equal tiles (multiple of `unit`, <= max_tile).

    Returns (padded_dim, tile). Waste is at most `unit` rows per tile (<2%),
    unlike rounding up to a fixed large tile.
    """
    d = _round_up(dim, unit)
    n = _cdiv(d, max_tile)
    tile = _round_up(_cdiv(d, n), unit)
    return n * tile, tile


def _pick_tile(padded, unit, max_tile):
    """Largest multiple of `unit` that divides `padded` and is <= max_tile."""
    m = padded // unit
    for d in range(min(m, max_tile // unit), 0, -1):
        if m % d == 0:
            return d * unit
    return unit


def _spec(shape, index_map, buffers=2):
    """BlockSpec with optional non-default pipelining depth (graceful fallback)."""
    if buffers != 2:
        try:
            return pl.BlockSpec(shape, index_map, pipeline_mode=pl.Buffered(buffers))
        except Exception:  # older JAX without Buffered/pipeline_mode
            pass
    return pl.BlockSpec(shape, index_map)


# --------------------------------------------------------------------------- #
# One-time parameter relayout (hoisted out of the per-call path).
# --------------------------------------------------------------------------- #
def prepare_params(w, b, compute_dtype=None):
    """Relayout nn.Linear params once for the kernel.

    w: (num_classes, input_size) -> w_t: (k_pad, n_pad) transposed + zero-padded
    b: (num_classes,)            -> bias: (1, n_pad)
    compute_dtype: e.g. jnp.bfloat16 to halve weight HBM bytes (f32 accumulation
    is kept in-kernel); default keeps the original dtype.
    """
    out_dim, in_dim = w.shape
    if compute_dtype is not None:
        w = w.astype(compute_dtype)

    n_pad, _ = _balanced_pad(out_dim, _LANE, _MAX_TN)
    if in_dim <= _MAX_TK:
        k_pad = in_dim                       # no K tiling needed; no padding
    else:
        k_pad, _ = _balanced_pad(in_dim, _LANE, _MAX_TK)

    w_t = jnp.pad(w.T, ((0, k_pad - in_dim), (0, n_pad - out_dim)))
    bias = jnp.pad(b.reshape(1, -1), ((0, 0), (0, n_pad - out_dim)))
    return w_t, bias


# --------------------------------------------------------------------------- #
# Kernels.
# --------------------------------------------------------------------------- #
def _linear_bias_kernel(x_ref, w_ref, b_ref, o_ref):
    # Single K block: fused MXU matmul (f32 accumulation) + VPU bias add.
    w = w_ref[...]
    acc = jnp.dot(x_ref[...].astype(w.dtype), w, preferred_element_type=jnp.float32)
    o_ref[...] = (acc + b_ref[...]).astype(o_ref.dtype)


def _linear_bias_acc_kernel(x_ref, w_ref, b_ref, o_ref, acc_ref):
    # K-tiled: accumulate partial products in an f32 VMEM scratch (P3 pattern).
    k = pl.program_id(2)

    @pl.when(k == 0)
    def _():
        acc_ref[...] = jnp.zeros_like(acc_ref)

    w = w_ref[...]
    acc_ref[...] += jnp.dot(x_ref[...].astype(w.dtype), w,
                            preferred_element_type=jnp.float32)

    @pl.when(k == pl.num_programs(2) - 1)
    def _():
        o_ref[...] = (acc_ref[...] + b_ref[...]).astype(o_ref.dtype)


# --------------------------------------------------------------------------- #
# Forward pass.
# --------------------------------------------------------------------------- #
@functools.partial(jax.jit, static_argnames=("out_dim",))
def fcl_forward(x, w_t, bias, *, out_dim):
    """out = x @ W.T + b, with (w_t, bias) pre-laid-out by prepare_params()."""
    batch, in_dim = x.shape
    k_pad, n_pad = w_t.shape

    # ---- tile selection ----------------------------------------------------
    b_pad, tm = _balanced_pad(batch, _SUBLANE, _MAX_TM)    # minimal batch pad
    tn = _pick_tile(n_pad, _LANE, _MAX_TN)
    tk = k_pad if k_pad <= _MAX_TK else _pick_tile(k_pad, _LANE, _MAX_TK)
    gm, gn, gk = b_pad // tm, n_pad // tn, k_pad // tk
    grid = (gm, gn, gk)

    # ---- pad activations (weights were padded once, outside this call) ------
    if (b_pad, k_pad) != (batch, in_dim):
        x = jnp.pad(x, ((0, b_pad - batch), (0, k_pad - in_dim)))

    x_itm = jnp.dtype(x.dtype).itemsize
    w_itm = jnp.dtype(w_t.dtype).itemsize
    b_itm = jnp.dtype(bias.dtype).itemsize

    # Single-buffer grid-invariant blocks when it actually saves VMEM.
    w_invariant = (gn == 1 and gk == 1)
    w_bufs = 1 if (w_invariant and tk * tn * w_itm > (1 << 20)) else 2
    b_bufs = 1 if (gn == 1 and tn * b_itm > (1 << 19)) else 2   # bias is tiny

    in_specs = [
        _spec((tm, tk), lambda i, j, k: (i, k)),                    # x streamed
        _spec((tk, tn), lambda i, j, k: (k, j), buffers=w_bufs),    # weight block
        _spec((1, tn), lambda i, j, k: (0, j), buffers=b_bufs),     # bias block
    ]
    out_specs = pl.BlockSpec((tm, tn), lambda i, j, k: (i, j))

    if gk == 1:
        kernel, scratch = _linear_bias_kernel, []
    else:
        kernel, scratch = _linear_bias_acc_kernel, [pltpu.VMEM((tm, tn), jnp.float32)]

    # ---- VMEM budget + compiler params --------------------------------------
    vmem_bytes = (2 * tm * tk * x_itm            # x (double-buffered)
                  + w_bufs * tk * tn * w_itm     # weight
                  + b_bufs * tn * b_itm          # bias
                  + 2 * tm * tn * x_itm          # output
                  + tm * tn * 4)                 # f32 accumulator
    vmem_limit = None if vmem_bytes <= 12 * 1024 * 1024 else int(
        min(vmem_bytes * 3 // 2 + (2 << 20), 48 << 20))   # safe on v7x (64 MiB)
    compiler_params = pltpu.CompilerParams(
        dimension_semantics=("parallel", "parallel", "arbitrary"),
        vmem_limit_bytes=vmem_limit,
    )

    cost = pl.CostEstimate(
        flops=2 * b_pad * k_pad * n_pad,
        bytes_accessed=int(b_pad * k_pad * x_itm + k_pad * n_pad * w_itm
                           + n_pad * b_itm + b_pad * n_pad * x_itm),
        transcendentals=0,
    )

    out_p = pl.pallas_call(
        kernel,
        out_shape=jax.ShapeDtypeStruct((b_pad, n_pad), x.dtype),
        grid_spec=pltpu.PrefetchScalarGridSpec(
            num_scalar_prefetch=0,
            grid=grid,
            in_specs=in_specs,
            out_specs=out_specs,
            scratch_shapes=scratch,
        ),
        compiler_params=compiler_params,
        cost_estimate=cost,
    )(x, w_t, bias)

    # Slice away batch / lane padding.
    return out_p[:batch, :out_dim]


def init_params(key, input_size, num_classes, dtype=jnp.float32):
    """Deterministic init mimicking PyTorch nn.Linear (U[-1/sqrt(fan_in), +])."""
    kw, kb = jax.random.split(key)
    bound = 1.0 / jnp.sqrt(jnp.asarray(input_size, jnp.float32))
    w = jax.random.uniform(kw, (num_classes, input_size), dtype, -bound, bound)
    b = jax.random.uniform(kb, (num_classes,), dtype, -bound, bound)
    return w, b


if __name__ == "__main__":
    key = jax.random.PRNGKey(0)
    k_x, k_p = jax.random.split(key)

    batch, input_size, num_classes = 8, 32, 16

    x = jax.random.normal(k_x, (batch, input_size), jnp.float32)
    w, b = init_params(k_p, input_size, num_classes)

    # One-time relayout (outside the hot path).
    w_t, bias = prepare_params(w, b)

    out = fcl_forward(x, w_t, bias, out_dim=num_classes)
    out = jax.block_until_ready(out)

    # Reference: PyTorch nn.Linear semantics.
    ref = x @ w.T + b
    assert out.shape == (batch, num_classes)
    assert jnp.allclose(out, ref, atol=1e-4, rtol=1e-4)

    print("KERNEL_OK")
</pallas_src>

<mosaic_0001>
module attributes {stable_mosaic.version = 11 : i64} {
  func.func @_linear_bias_kernel(%arg0: i32, %arg1: i32, %arg2: i32, %arg3: memref<8x32xf32, #tpu.memory_space<vmem>>, %arg4: memref<32x128xf32, #tpu.memory_space<vmem>>, %arg5: memref<1x128xf32, #tpu.memory_space<vmem>>, %arg6: memref<8x128xf32, #tpu.memory_space<vmem>>) attributes {dimension_semantics = [#tpu.dimension_semantics<parallel>, #tpu.dimension_semantics<parallel>, #tpu.dimension_semantics<arbitrary>], iteration_bounds = array<i64: 1, 1, 1>, scalar_prefetch = 0 : i64, scratch_operands = 0 : i64, tpu.core_type = #tpu.core_type<tc>, window_params = [{transform_indices = @transform_0, window_bounds = array<i64: 8, 32>}, {transform_indices = @transform_1, window_bounds = array<i64: 32, 128>}, {transform_indices = @transform_2, window_bounds = array<i64: 1, 128>}, {transform_indices = @transform_3, window_bounds = array<i64: 8, 128>}]} {
    %c0 = arith.constant 0 : index
    %c0_0 = arith.constant 0 : index
    %0 = vector.load %arg4[%c0, %c0_0] : memref<32x128xf32, #tpu.memory_space<vmem>>, vector<32x128xf32>
    %c0_1 = arith.constant 0 : index
    %c0_2 = arith.constant 0 : index
    %1 = vector.load %arg3[%c0_1, %c0_2] : memref<8x32xf32, #tpu.memory_space<vmem>>, vector<8x32xf32>
    %cst = arith.constant dense<0.000000e+00> : vector<8x128xf32>
    %2 = tpu.matmul %1, %0, %cst {dimension_numbers = #tpu.dot_dimension_numbers<[1], [0], [0], [1], [0, 0, 1, 1], [], []>} : vector<8x32xf32>, vector<32x128xf32>, vector<8x128xf32> -> vector<8x128xf32>
    %c0_3 = arith.constant 0 : index
    %c0_4 = arith.constant 0 : index
    %3 = vector.load %arg5[%c0_3, %c0_4] : memref<1x128xf32, #tpu.memory_space<vmem>>, vector<1x128xf32>
    %4 = vector.broadcast %3 : vector<1x128xf32> to vector<8x128xf32>
    %5 = arith.addf %2, %4 : vector<8x128xf32>
    %c0_5 = arith.constant 0 : index
    %c0_6 = arith.constant 0 : index
    %6 = vector.load %arg6[%c0_5, %c0_6] : memref<8x128xf32, #tpu.memory_space<vmem>>, vector<8x128xf32>
    tpu.vector_store %arg6[%c0_5, %c0_6], %5 {strides = array<i32>} : memref<8x128xf32, #tpu.memory_space<vmem>>, vector<8x128xf32>,
    return
  }
  func.func @transform_0(%arg0: i32, %arg1: i32, %arg2: i32) -> (i32, i32) {
    %c0_i32 = arith.constant 0 : i32
    return %arg0, %arg2 : i32, i32
  }
  func.func @transform_1(%arg0: i32, %arg1: i32, %arg2: i32) -> (i32, i32) {
    %c0_i32 = arith.constant 0 : i32
    return %arg2, %arg1 : i32, i32
  }
  func.func @transform_2(%arg0: i32, %arg1: i32, %arg2: i32) -> (i32, i32) {
    %c0_i32 = arith.constant 0 : i32
    %c0_i32_0 = arith.constant 0 : i32
    return %c0_i32, %arg1 : i32, i32
  }
  func.func @transform_3(%arg0: i32, %arg1: i32, %arg2: i32) -> (i32, i32) {
    %c0_i32 = arith.constant 0 : i32
    return %arg0, %arg1 : i32, i32
  }
}

</mosaic_0001>

<bundles_post_ra>
// kernel: fcl_forward.1
= control target key start
LH: loop header
LB: loop body
LE: loop exit
PB: predicated region body
PF: predicated region fallthrough
CT: control target
= control target key end

     0   :  { %8 = vsyncpa [#allocation3], 0  ;;  %s322_s0 = inlined_call_operand.hbm [shape: f32[8,32], index: 0, kind: input, shape index: {}]   ;;  %s323_s1 = inlined_call_operand.hbm [shape: f32[32,128], index: 1, kind: input, shape index: {}]   ;;  %s324_s2 = inlined_call_operand.vmem [shape: f32[1,128], index: 2, kind: input, shape index: {}]   ;;  %s325_s3 = inlined_call_operand.hbm [shape: f32[8,128], index: 3, kind: output, shape index: {}]  }
   0x1   :  { %9 = vsyncpa [#allocation6], 0 }
   0x2   :  { %10 = vsyncpa [#allocation4], 0  ;;  %s248_s12 = smov [#allocation2]   ;;  %s249_s14 = smov [#allocation5]  }
   0x3   :  { %s17_s13 = sshll.u32 %s248_s12, 4  ;;  %s26_s15 = sshll.u32 %s249_s14, 4  ;;  %s18_s13 = int_to_ptr.vmem [resolvable:$true] %s17_s13  ;;  %s276_s15 = int_to_ptr.vmem [resolvable:$true] %s26_s15 }
   0x4   :  { %s176_s18 = scalar_lea.hbm %s322_s0, 128 }
   0x5   :  { %p177_p0 = scmp.ne.s32.totalorder %s322_s0, %s176_s18  ;;  %p180_p1 = scmp.lt.u32.totalorder %s176_s18, %s322_s0 }
   0x7   :  { %p182_p2 = pnand %p180_p1, %p177_p0 }
   0x9   :  { %185 = shalt.err (!%p182_p2)
}
   0xa   :  { %s186_s23 = scalar_lea.vmem %s18_s13, 128  ;;  %p191_p4 = scmp.lt.s32.totalorder %s18_s13, %s18_s13 }
   0xb   :  { %p187_p3 = scmp.ne.s32.totalorder %s18_s13, %s186_s23  ;;  %p192_p5 = scmp.lt.s32.totalorder %s186_s23, %s186_s23 }
   0xd   :  { %p193_p6 = por %p192_p5, %p191_p4 }
   0xf   :  { %p194_p7 = pnand %p193_p6, %p187_p3 }
  0x11   :  { %197 = shalt.err (!%p194_p7)
}
  0x12   :  { %20 = dma.hbm_to_vmem [thread:$0]  %s322_s0, 128, %s18_s13, [#allocation3]  }
  0x13   :  { %s198_s28 = scalar_lea.hbm %s323_s1, 512 }
  0x14   :  { %p199_p8 = scmp.ne.s32.totalorder %s323_s1, %s198_s28  ;;  %p202_p9 = scmp.lt.u32.totalorder %s198_s28, %s323_s1 }
  0x16   :  { %p204_p10 = pnand %p202_p9, %p199_p8 }
  0x18   :  { %207 = shalt.err (!%p204_p10)
}
  0x19   :  { %s208_s6 = scalar_lea.vmem %s276_s15, 512  ;;  %p213_p12 = scmp.lt.s32.totalorder %s276_s15, %s276_s15 }
  0x1a   :  { %p209_p11 = scmp.ne.s32.totalorder %s276_s15, %s208_s6  ;;  %p214_p13 = scmp.lt.s32.totalorder %s208_s6, %s208_s6 }
  0x1c   :  { %p215_p0 = por %p214_p13, %p213_p12 }
  0x1e   :  { %p216_p1 = pnand %p215_p0, %p209_p11 }
  0x20   :  { %219 = shalt.err (!%p216_p1)
}
  0x21   :  { %s250_s0 = smov 128   ;;  %s251_s7 = smov 8  }
  0x22   :  { %32 = dma.hbm_to_vmem [thread:$0]  %s323_s1, 512, %s276_s15, [#allocation6], %s250_s0, %s250_s0, %s251_s7  }
  0x23   :  { %242 = dma.done.wait [#allocation3], 128  }
  0x24   :  { %243 = vsyncadd [#allocation3], 4294967168 }
  0x25   :  { %244 = dma.done.wait [#allocation6], 512  }
  0x26   :  { %245 = vsyncadd [#allocation6], 4294966784  ;;  %v252_v0 = vmov 0.0|0.0   ;;  %vm253_vm0 = vmmov 0   ;;  %v254_v1 = vmov 0.0   ;;  %v41_v2 = vld [vmem:[#allocation5] sm:$0xff] }
  0x27   :  { %162 = vmatprep.subr.bf16.mxu0 %v252_v0  ;;  %159 = vmatprep.mubr.msk.f32.mxu0 %vm253_vm0, %v254_v1  ;;  %v42_v3 = vld [vmem:[#allocation5 + $0x8] sm:$0xff]  ;;  %v43_v4 = vld [vmem:[#allocation5 + $0x10] sm:$0xff]  ;;  %v44_v6 = vld [vmem:[#allocation5 + $0x18] sm:$0xff]  ;;  %vm53_vm1 = vcmask 261120   ;;  %s255_s11 = smov [#allocation7]  }
  0x28   :  { %v163_v5 = vpack.c.bf16 %v42_v3, %v41_v2  ;;  %v166_v7 = vpack.c.bf16 %v44_v6, %v43_v4  ;;  %v45_v8 = vld [vmem:[#allocation2] sm:$0xff]  ;;  %s134_s12 = sshll.u32 %s255_s11, 4  ;;  %s135_s12 = int_to_ptr.vmem [resolvable:$true] %s134_s12 }
  0x29   :  { %v144_v9 = vld [vmem:[%s324_s2] ss:$0 sm:$0xff]  ;;  %s220_s13 = scalar_lea.vmem %s135_s12, 128  ;;  %p225_p3 = scmp.lt.s32.totalorder %s135_s12, %s135_s12 }
  0x2a   :  { %164 = vmatpush3.bf16.msra.mxu0 %v163_v5  ;;  %p221_p2 = scmp.ne.s32.totalorder %s135_s12, %s220_s13  ;;  %p226_p4 = scmp.lt.s32.totalorder %s220_s13, %s220_s13 }
  0x2b   :  { %165 = vmatprep.subr.bf16.mxu0 %v252_v0 }
  0x2c   :  { %p227_p5 = por %p226_p4, %p225_p3 }
  0x2e   :  { %167 = vmatpush3.bf16.msra.mxu0 %v166_v7  ;;  %p228_p6 = pnand %p227_p5, %p221_p2 }
  0x31   :  { %160 = vmatmul.mubr.msk.f32.vlgmr.msra.gmra.mrb[0].mxu0 %vm53_vm1, %v45_v8 }
 0x104   :  { %v123_v10 = vpop.f32.mrb[0].mxu0 }
 0x105   :  { %v124_v11 = vadd.f32 %v144_v9, %v123_v10  ;;  %v161_v12 = vpop.f32.mrb[1].mxu0 }
 0x107   :  { %127 = vst [vmem:[#allocation7] sm:$0xff] %v124_v11 }
 0x108   :  { %231 = shalt.err (!%p228_p6)
}
 0x109   :  { %s232_s16 = scalar_lea.hbm %s325_s3, 128 }
 0x10a   :  { %p233_p7 = scmp.ne.s32.totalorder %s325_s3, %s232_s16  ;;  %p236_p8 = scmp.lt.u32.totalorder %s232_s16, %s325_s3 }
 0x10c   :  { %p238_p9 = pnand %p236_p8, %p233_p7 }
 0x10e   :  { %241 = shalt.err (!%p238_p9)
}
 0x10f   :  { %137 = dma.vmem_to_hbm [thread:$0]  %s135_s12, 128, %s325_s3, [#allocation4]  }
 0x110   :  { %246 = dma.done.wait [#allocation4], 128  }
 0x111   :  { %247 = vsyncadd [#allocation4], 4294967168 }
 0x112   :  { %141 = vsyncpa [#allocation3], 1 }
 0x113   :  { %142 = vsyncpa [#allocation6], 1 }
 0x114   :  { %143 = vsyncpa [#allocation4], 1 }

</bundles_post_ra>
